<compile_context>
chip_gen: v6e
topology: v6e:2x2x1
jax: 0.10.0
libtpu: 0.0.40
codegen_flags: <defaults>
</compile_context>

<pallas_src>
import jax
import jax.numpy as jnp
import numpy as np
from jax import lax
from jax.experimental import pallas as pl
from jax.experimental.pallas import tpu as pltpu

# ----------------------------- config ----------------------------------------
N = 16          # number of rows in `inputs` (batch / graph nodes)
D = 32          # input_dim
BN_EPS = 1e-5
F32 = jnp.float32


def _vmem():
    return pl.BlockSpec(memory_space=pltpu.MemorySpace.VMEM)


def _smem():
    return pl.BlockSpec(memory_space=pltpu.MemorySpace.SMEM)


# ------------------------------- kernel ---------------------------------------
def _bilinear_decoder_kernel(x_ref, rel_ref, wlin_ref, blin_ref, out_ref):
    """Fused BilinearDecoder forward.

    x_ref   : [N, D]  inputs                         (VMEM)
    rel_ref : [D, D]  relation                       (VMEM)
    wlin_ref: [1, N]  Linear(N, 1) weight, lane-dense (VMEM)
    blin_ref: [1, 1]  Linear bias                    (SMEM scalar)
    out_ref : [N, 1]
    """
    x = x_ref[...]

    # intermediate_product = inputs @ relation                      -> [N, D]
    ip = jnp.dot(x, rel_ref[...], preferred_element_type=F32)

    # rec = intermediate_product @ inputs.T  (transposed-RHS contraction,
    # no explicit transpose)                                        -> [N, N]
    rec = lax.dot_general(
        ip, x,
        dimension_numbers=(((1,), (1,)), ((), ())),
        preferred_element_type=F32,
    )
    rec = jnp.maximum(rec, 0.0)                                      # ReLU

    # BatchNorm1d(N) on a fresh module in training mode:
    # per-column batch statistics (biased variance), gamma=1, beta=0.
    mean = jnp.mean(rec, axis=0, keepdims=True)                      # [1, N]
    var = jnp.mean((rec - mean) ** 2, axis=0, keepdims=True)         # [1, N]
    inv = lax.rsqrt(var + BN_EPS)                                    # [1, N]

    # Fold BN into the Linear(N, 1) weights:
    #   rec_bn @ w = rec @ (w * inv) - sum(mean * inv * w)
    w_eff = wlin_ref[...] * inv                                      # [1, N]
    bias = blin_ref[0, 0] - jnp.sum(mean * w_eff)                    # scalar
    out_ref[...] = jnp.sum(rec * w_eff, axis=1, keepdims=True) + bias


# ------------------------------- wrapper ---------------------------------------
def bilinear_decoder_forward(inputs, params):
    flops = (2 * N * D * D          # inputs @ relation
             + 2 * N * N * D        # ip @ inputs.T
             + N * N                # ReLU
             + 6 * N * N            # BN stats + weighted-sum Linear
             + 4 * N)               # fold / bias
    bytes_accessed = 4 * (N * D + D * D + N + 1 + N)
    return pl.pallas_call(
        _bilinear_decoder_kernel,
        out_shape=jax.ShapeDtypeStruct((N, 1), F32),
        in_specs=[_vmem(), _vmem(), _vmem(), _smem()],
        out_specs=_vmem(),
        compiler_params=pltpu.CompilerParams(vmem_limit_bytes=16 * 1024 * 1024),
        cost_estimate=pl.CostEstimate(
            flops=flops, transcendentals=N, bytes_accessed=bytes_accessed
        ),
    )(inputs, params["relation"], params["wlin"], params["blin"])


# ------------------------- deterministic parameters -----------------------------
def init_params(key):
    k_rel, k_w, k_b = jax.random.split(key, 3)
    # relation: xavier_uniform_ on [D, D]  -> bound = sqrt(6 / (D + D))
    bound_rel = float(np.sqrt(6.0 / (D + D)))
    relation = jax.random.uniform(k_rel, (D, D), F32, -bound_rel, bound_rel)
    # Linear(N, 1): PyTorch default init  U(-1/sqrt(N), 1/sqrt(N)),
    # weight stored in PyTorch layout [out_features=1, in_features=N] (lane-dense).
    bound_lin = 1.0 / float(np.sqrt(N))
    wlin = jax.random.uniform(k_w, (1, N), F32, -bound_lin, bound_lin)
    blin = jax.random.uniform(k_b, (1, 1), F32, -bound_lin, bound_lin)
    return {"relation": relation, "wlin": wlin, "blin": blin}


# ------------------------------ pure-JAX reference -------------------------------
def reference_forward(inputs, params):
    ip = inputs @ params["relation"]
    rec = ip @ inputs.T
    rec = jnp.maximum(rec, 0.0)
    mean = jnp.mean(rec, axis=0, keepdims=True)
    var = jnp.mean((rec - mean) ** 2, axis=0, keepdims=True)
    rec_bn = (rec - mean) * lax.rsqrt(var + BN_EPS)
    return rec_bn @ params["wlin"].T + params["blin"]


if __name__ == "__main__":
    key = jax.random.PRNGKey(0)
    k_in, k_par = jax.random.split(key)
    inputs = jax.random.normal(k_in, (N, D), F32)
    params = init_params(k_par)

    out = bilinear_decoder_forward(inputs, params)
    out = jax.block_until_ready(out)

    ref = reference_forward(inputs, params)
    assert out.shape == (N, 1)
    assert np.all(np.isfinite(np.asarray(out)))
    assert np.allclose(np.asarray(out), np.asarray(ref), atol=1e-5, rtol=1e-5)
    print("KERNEL_OK")
</pallas_src>

<mosaic_0001>
module attributes {stable_mosaic.version = 11 : i64} {
  func.func @_bilinear_decoder_kernel(%arg0: memref<16x32xf32, #tpu.memory_space<vmem>>, %arg1: memref<32x32xf32, #tpu.memory_space<vmem>>, %arg2: memref<1x16xf32, #tpu.memory_space<vmem>>, %arg3: memref<1x1xf32, #tpu.memory_space<smem>>, %arg4: memref<16x1xf32, #tpu.memory_space<vmem>>) attributes {dimension_semantics = [], scalar_prefetch = 0 : i64, scratch_operands = 0 : i64, tpu.core_type = #tpu.core_type<tc>} {
    %c0 = arith.constant 0 : index
    %c0_0 = arith.constant 0 : index
    %0 = vector.load %arg0[%c0, %c0_0] : memref<16x32xf32, #tpu.memory_space<vmem>>, vector<16x32xf32>
    %c0_1 = arith.constant 0 : index
    %c0_2 = arith.constant 0 : index
    %1 = vector.load %arg1[%c0_1, %c0_2] : memref<32x32xf32, #tpu.memory_space<vmem>>, vector<32x32xf32>
    %cst = arith.constant dense<0.000000e+00> : vector<16x32xf32>
    %2 = tpu.matmul %0, %1, %cst {dimension_numbers = #tpu.dot_dimension_numbers<[1], [0], [0], [1], [0, 0, 1, 1], [], []>} : vector<16x32xf32>, vector<32x32xf32>, vector<16x32xf32> -> vector<16x32xf32>
    %cst_3 = arith.constant dense<0.000000e+00> : vector<16x16xf32>
    %3 = tpu.matmul %2, %0, %cst_3 {dimension_numbers = #tpu.dot_dimension_numbers<[1], [1], [0], [0], [0, 0, 1, 0], [], []>} : vector<16x32xf32>, vector<16x32xf32>, vector<16x16xf32> -> vector<16x16xf32>
    %cst_4 = arith.constant 0.000000e+00 : f32
    %4 = vector.broadcast %cst_4 : f32 to vector<16x16xf32>
    %5 = arith.maximumf %3, %4 : vector<16x16xf32>
    %cst_5 = arith.constant dense<0.000000e+00> : vector<16xf32>
    %6 = vector.multi_reduction <add>, %5, %cst_5 [0] : vector<16x16xf32> to vector<16xf32>
    %7 = vector.shape_cast %6 : vector<16xf32> to vector<1x16xf32>
    %cst_6 = arith.constant 1.600000e+01 : f32
    %8 = vector.broadcast %cst_6 : f32 to vector<1x16xf32>
    %9 = arith.divf %7, %8 : vector<1x16xf32>
    %10 = vector.broadcast %9 : vector<1x16xf32> to vector<16x16xf32>
    %11 = arith.subf %5, %10 : vector<16x16xf32>
    %12 = arith.mulf %11, %11 : vector<16x16xf32>
    %cst_7 = arith.constant dense<0.000000e+00> : vector<16xf32>
    %13 = vector.multi_reduction <add>, %12, %cst_7 [0] : vector<16x16xf32> to vector<16xf32>
    %14 = vector.shape_cast %13 : vector<16xf32> to vector<1x16xf32>
    %cst_8 = arith.constant 1.600000e+01 : f32
    %15 = vector.broadcast %cst_8 : f32 to vector<1x16xf32>
    %16 = arith.divf %14, %15 : vector<1x16xf32>
    %cst_9 = arith.constant 9.99999974E-6 : f32
    %17 = vector.broadcast %cst_9 : f32 to vector<1x16xf32>
    %18 = arith.addf %16, %17 : vector<1x16xf32>
    %19 = math.rsqrt %18 : vector<1x16xf32>
    %c0_10 = arith.constant 0 : index
    %c0_11 = arith.constant 0 : index
    %20 = vector.load %arg2[%c0_10, %c0_11] : memref<1x16xf32, #tpu.memory_space<vmem>>, vector<1x16xf32>
    %21 = arith.mulf %20, %19 : vector<1x16xf32>
    %c0_12 = arith.constant 0 : index
    %c0_13 = arith.constant 0 : index
    %22 = memref.load %arg3[%c0_12, %c0_13] : memref<1x1xf32, #tpu.memory_space<smem>>
    %23 = arith.mulf %9, %21 : vector<1x16xf32>
    %24 = vector.shape_cast %23 : vector<1x16xf32> to vector<1x1x16xf32>
    %cst_14 = arith.constant dense<0.000000e+00> : vector<1xf32>
    %25 = vector.multi_reduction <add>, %24, %cst_14 [1, 2] : vector<1x1x16xf32> to vector<1xf32>
    %26 = vector.shape_cast %25 : vector<1xf32> to vector<1x1x1xf32>
    %27 = vector.extract %26[0, 0, 0] : f32 from vector<1x1x1xf32>
    %28 = arith.subf %22, %27 : f32
    %29 = vector.broadcast %21 : vector<1x16xf32> to vector<16x16xf32>
    %30 = arith.mulf %5, %29 : vector<16x16xf32>
    %cst_15 = arith.constant dense<0.000000e+00> : vector<16xf32>
    %31 = vector.multi_reduction <add>, %30, %cst_15 [1] : vector<16x16xf32> to vector<16xf32>
    %32 = vector.shape_cast %31 : vector<16xf32> to vector<16x1xf32>
    %33 = vector.broadcast %28 : f32 to vector<16x1xf32>
    %34 = arith.addf %32, %33 : vector<16x1xf32>
    %c0_16 = arith.constant 0 : index
    %c0_17 = arith.constant 0 : index
    %35 = vector.load %arg4[%c0_16, %c0_17] : memref<16x1xf32, #tpu.memory_space<vmem>>, vector<16x1xf32>
    tpu.vector_store %arg4[%c0_16, %c0_17], %34 {strides = array<i32>} : memref<16x1xf32, #tpu.memory_space<vmem>>, vector<16x1xf32>,
    return
  }
}

</mosaic_0001>

<bundles_post_ra>
// kernel: tpu_custom_call.1
= control target key start
LH: loop header
LB: loop body
LE: loop exit
PB: predicated region body
PF: predicated region fallthrough
CT: control target
= control target key end

     0   :  { %10 = vsyncpa [#allocation4], 0  ;;  %s434_s0 = inlined_call_operand.hbm [shape: f32[16,32], index: 0, kind: input, shape index: {}]   ;;  %s435_s1 = inlined_call_operand.hbm [shape: f32[32,32], index: 1, kind: input, shape index: {}]   ;;  %s436_s2 = inlined_call_operand.vmem [shape: f32[1,16], index: 2, kind: input, shape index: {}]   ;;  %s437_s3 = inlined_call_operand.<no memory space> [shape: f32[1,1], index: 3, kind: input, shape index: {}]   ;;  %s438_s4 = inlined_call_operand.vmem [shape: f32[16,1], index: 4, kind: output, shape index: {}]  }
   0x1   :  { %11 = vsyncpa [#allocation6], 0  ;;  %s373_s15 = smov [#allocation3]  }
   0x2   :  { %s17_s16 = sshll.u32 %s373_s15, 4  ;;  %s18_s16 = int_to_ptr.vmem [resolvable:$true] %s17_s16 }
   0x3   :  { %s337_s17 = scalar_lea.vmem %s18_s16, 256  ;;  %p342_p1 = scmp.lt.s32.totalorder %s18_s16, %s18_s16 }
   0x4   :  { %p338_p0 = scmp.ne.s32.totalorder %s18_s16, %s337_s17  ;;  %p343_p2 = scmp.lt.s32.totalorder %s337_s17, %s337_s17 }
   0x6   :  { %p344_p3 = por %p343_p2, %p342_p1 }
   0x8   :  { %p345_p4 = pnand %p344_p3, %p338_p0 }
   0xa   :  { %348 = shalt.err (!%p345_p4)
}
   0xb   :  { %s374_s18 = smov 128   ;;  %s375_s19 = smov 8  }
   0xc   :  { %23 = dma.hbm_to_vmem [thread:$0]  %s434_s0, 256, %s18_s16, [#allocation4], %s374_s18, %s374_s18, %s375_s19  }
   0xd   :  { %s376_s22 = smov [#allocation5]  }
   0xe   :  { %s29_s23 = sshll.u32 %s376_s22, 4  ;;  %s30_s23 = int_to_ptr.vmem [resolvable:$true] %s29_s23 }
   0xf   :  { %s357_s24 = scalar_lea.vmem %s30_s23, 512  ;;  %p362_p6 = scmp.lt.s32.totalorder %s30_s23, %s30_s23 }
  0x10   :  { %p358_p5 = scmp.ne.s32.totalorder %s30_s23, %s357_s24  ;;  %p363_p7 = scmp.lt.s32.totalorder %s357_s24, %s357_s24 }
  0x12   :  { %p364_p8 = por %p363_p7, %p362_p6 }
  0x14   :  { %p365_p9 = pnand %p364_p8, %p358_p5 }
  0x16   :  { %368 = shalt.err (!%p365_p9)
}
  0x17   :  { %35 = dma.hbm_to_vmem [thread:$0]  %s435_s1, 512, %s30_s23, [#allocation6], %s374_s18, %s374_s18, %s375_s19  }
  0x18   :  { %369 = dma.done.wait [#allocation4], 256  }
  0x19   :  { %370 = vsyncadd [#allocation4], 4294967040 }
  0x1a   :  { %371 = dma.done.wait [#allocation6], 512  }
  0x1b   :  { %372 = vsyncadd [#allocation6], 4294966784  ;;  %vm52_vm0 = vcmask 261120   ;;  %v51_v0 = vld [vmem:[#allocation5 + $0x18] sm:$0xff]  ;;  %v50_v1 = vld [vmem:[#allocation5 + $0x10] sm:$0xff]  ;;  %vm217_vm1 = vcmask 130048   ;;  %v262_v37 = vlaneseq }
  0x1c   :  { %303 = vmatprep.subr.mxu0 %v51_v0  ;;  %v46_v2 = vld [vmem:[#allocation3] sm:$0xff]  ;;  %v49_v3 = vld [vmem:[#allocation5 + $0x8] sm:$0xff]  ;;  %v47_v4 = vld [vmem:[#allocation3 + $0x8] sm:$0xff]  ;;  %vm249_vm2 = vcmask 122880   ;;  %vm278_vm3 = vcmask 7168  }
  0x1d   :  { %304 = vmatpush3.msra.mxu0 %v51_v0  ;;  %311 = vmatprep.mubr.msk.f32.mxu0 %vm52_vm0, %v46_v2  ;;  %v48_v5 = vld [vmem:[#allocation5] sm:$0xff]  ;;  %v263_v38 = vshrl.u32 %v262_v37, 7  ;;  %v245_v39 = vld [vmem:[%s436_s2] sm:$0x1] }
  0x1e   :  { %305 = vmatprep.subr.mxu0 %v50_v1  ;;  %314 = vmatprep.subr.msk.mxu1 %vm52_vm0, %v47_v4 }
  0x1f   :  { %306 = vmatpush3.msra.mxu0 %v50_v1  ;;  %315 = vmatpush3.xpose.msk.msra.mxu1 %vm52_vm0, %v47_v4  ;;  %v264_v40 = vsub.s32 0, %v263_v38 }
  0x20   :  { %307 = vmatprep.subr.mxu0 %v49_v3  ;;  %316 = vmatprep.subr.msk.mxu1 %vm52_vm0, %v46_v2 }
  0x21   :  { %308 = vmatpush3.msra.mxu0 %v49_v3 }
  0x22   :  { %309 = vmatprep.subr.mxu0 %v48_v5 }
  0x23   :  { %310 = vmatpush3.msra.mxu0 %v48_v5  ;;  %317 = vmatpush3.xpose.msk.msra.mxu1 %vm52_vm0, %v46_v2 }
  0x24   :  { %312 = vmatmul.mubr.msk.f32.vlgmr.msra.gmra.mxu0 %vm52_vm0, %v47_v4 }
  0xe4   :  { %v313_v6 = vpop.f32.mrf.mxu0 }
  0xe6   :  { %v125_v7 = vpop.f32.mrf.mxu0 }
  0xe7   :  { %318 = vmatprep.mubr.msk.f32.mxu1 %vm52_vm0, %v125_v7 }
  0xe8   :  { %319 = vmatmul.mubr.msk.f32.vlgmr.msra.gmra.mxu1 %vm52_vm0, %v313_v6 }
 0x1a8   :  { %v320_v8 = vpop.f32.mrf.mxu1 }
 0x1a9   :  { %v216_v9 = vmax.f32 %v320_v8, 0.0 }
 0x1aa   :  { %v206_v10 = vpop.f32.mrf.mxu1 }
 0x1ab   :  { %v215_v11 = vmax.f32 %v206_v10, 0.0  ;;  %v219_v12 = vsel %vm217_vm1, %v216_v9, 0.0 }
 0x1ad   :  { %v218_v13 = vsel %vm217_vm1, %v215_v11, 0.0 }
 0x1ae   :  { %v220_v14 = vadd.f32 %v219_v12, %v218_v13 }
 0x1b0   :  { %v221_v15 = vrot.slane %v220_v14, 4 }
 0x1b2   :  { %v222_v16 = vadd.f32 %v221_v15, %v220_v14 }
 0x1b4   :  { %v223_v17 = vrot.slane %v222_v16, 2 }
 0x1b6   :  { %v224_v18 = vadd.f32 %v223_v17, %v222_v16 }
 0x1b8   :  { %v225_v19 = vrot.slane %v224_v18, 1 }
 0x1ba   :  { %v226_v20 = vadd.f32 %v225_v19, %v224_v18 }
 0x1bc   :  { %v228_v21 = vmul.f32 0.0625, %v226_v20 }
 0x1be   :  { %v229_v22 = vsub.f32 %v215_v11, %v228_v21  ;;  %v230_v23 = vsub.f32 %v216_v9, %v228_v21 }
 0x1c0   :  { %v231_v24 = vmul.f32 %v229_v22, %v229_v22  ;;  %v232_v25 = vmul.f32 %v230_v23, %v230_v23 }
 0x1c2   :  { %v233_v26 = vsel %vm217_vm1, %v231_v24, 0.0  ;;  %v234_v27 = vsel %vm217_vm1, %v232_v25, 0.0 }
 0x1c3   :  { %v235_v28 = vadd.f32 %v234_v27, %v233_v26 }
 0x1c5   :  { %v236_v29 = vrot.slane %v235_v28, 4 }
 0x1c7   :  { %v237_v30 = vadd.f32 %v236_v29, %v235_v28 }
 0x1c9   :  { %v238_v31 = vrot.slane %v237_v30, 2 }
 0x1cb   :  { %v239_v32 = vadd.f32 %v238_v31, %v237_v30 }
 0x1cd   :  { %v240_v33 = vrot.slane %v239_v32, 1 }
 0x1cf   :  { %v241_v34 = vadd.f32 %v240_v33, %v239_v32 }
 0x1d1   :  { %v242_v35 = vmul.f32 0.0625, %v241_v34 }
 0x1d3   :  { %v243_v36 = vadd.f32 1e-05, %v242_v35 }
 0x1d5   :  { %327 = vrsqrt.f32 %v243_v36 }
 0x1e2   :  { %v328_v41 = vpop.eup %327 }
 0x1e3   :  { %v246_v42 = vmul.f32 %v328_v41, %v245_v39 }
 0x1e5   :  { %v248_v43 = vmul.f32 %v246_v42, %v228_v21  ;;  %v265_v44 = vrot.slane %v246_v42, %v264_v40 }
 0x1e7   :  { %v250_v45 = vsel %vm249_vm2, %v248_v43, 0.0  ;;  %v268_v46 = vmul.f32 %v265_v44, %v216_v9  ;;  %v267_v47 = vmul.f32 %v265_v44, %v215_v11 }
 0x1e8   :  { %251 = vadd.xlane.f32.xlu0 %v250_v45 }
 0x1e9   :  { %v272_v48 = vsel %vm217_vm1, %v268_v46, 0.0  ;;  %v269_v49 = vsel %vm217_vm1, %v267_v47, 0.0 }
 0x1ea   :  { %273 = vadd.xlane.f32.xlu1 %v272_v48 }
 0x1ec   :  { %270 = vadd.xlane.f32.xlu0 %v269_v49 }
 0x271   :  { %v252_v50 = vpop.xlane.xlu0 %251 }
 0x272   :  { %v253_v51 = vrot.slane %v252_v50, 4 }
 0x273   :  { %v274_v57 = vpop.xlane.xlu1 %273 }
 0x274   :  { %v254_v52 = vadd.f32 %v253_v51, %v252_v50 }
 0x275   :  { %v271_v58 = vpop.xlane.xlu0 %270 }
 0x276   :  { %v255_v53 = vrot.slane %v254_v52, 2 }
 0x278   :  { %v256_v54 = vadd.f32 %v255_v53, %v254_v52 }
 0x27a   :  { %v257_v55 = vrot.slane %v256_v54, 1 }
 0x27c   :  { %v258_v56 = vadd.f32 %v257_v55, %v256_v54 }
 0x27e   :  { %321 = vpush %v258_v56 }
 0x2af   :  { %s322_s2 = spop %321 }
 0x2b0   :  { %s260_s29 = ssub.f32 %s437_s3, %s322_s2 }
 0x2b2   :  { %v275_v59 = vstv %s260_s29 }
 0x2b3   :  { %v276_v60 = vadd.f32 %v275_v59, %v271_v58  ;;  %v277_v61 = vadd.f32 %v275_v59, %v274_v57 }
 0x2b5   :  { %279 = vst.msk [vmem:[%s438_s4] sm:$0xff] %vm278_vm3, %v276_v60  ;;  %280 = vst.msk [vmem:[%s438_s4 + $0x8] sm:$0xff] %vm278_vm3, %v277_v61 }
 0x2b6   :  { %285 = vsyncpa [#allocation4], 1 }
 0x2b7   :  { %286 = vsyncpa [#allocation6], 1 }

</bundles_post_ra>
